<compile_context>
chip_gen: v6e
topology: v6e:2x2x1
jax: 0.10.0
libtpu: 0.0.40
codegen_flags: <defaults>
</compile_context>

<pallas_src>
import jax
import jax.numpy as jnp
from jax import lax
from jax.experimental import pallas as pl
from jax.experimental.pallas import tpu as pltpu


# 32 MiB scoped VMEM: above the v5e 16 MiB default, comfortably inside v7x's
# 64 MiB physical, and our largest per-call footprint (~9 MiB) fits with room
# for deeper pipelining.
_VMEM_LIMIT_BYTES = 32 * 1024 * 1024


def _round_up(x, m):
    return (x + m - 1) // m * m


def _pick_tile(dim, preferred, minimum):
    """Largest power-of-two multiple of `minimum` (<= preferred) whose padded
    size stays within ~12.5% of the alignment-only padding; falls back to
    `minimum`.  Bounds wasted MXU flops / DMA for awkward dim values while
    keeping tiles as large (few grid steps, little HBM re-streaming) as possible.
    """
    dim_min = _round_up(dim, minimum)
    slack = dim_min // 8
    t = minimum
    while t * 2 <= preferred:
        t *= 2
    while t > minimum:
        if _round_up(dim, t) <= dim_min + slack:
            return t
        t //= 2
    return minimum


def _divisor_tile(dim_pad, preferred):
    """Largest tile <= preferred (halving) that divides dim_pad exactly."""
    t = preferred
    while dim_pad % t:
        t //= 2
    return t


# ---------------------------------------------------------------------------
# Kernel 1: prune-mask application + weight transpose (ModuleWrapper step 1).
# Pure HBM-bound elementwise pass; the tile transpose is done here (XLU has
# slack) so the MXU matmul loop can use a plain NN contraction.
# ---------------------------------------------------------------------------
def _mask_transpose_kernel(w_ref, m_ref, o_ref):
    o_ref[...] = (w_ref[...] * m_ref[...].astype(w_ref.dtype)).T


def _apply_mask_transposed(weight, mask, *, tn=512, tk=512):
    """Returns (weight * mask).T with shape (K, N). weight/mask are (N, K),
    already padded so N and K are multiples of 128."""
    N, K = weight.shape
    tn_ = _divisor_tile(N, tn)
    tk_ = _divisor_tile(K, tk)
    return pl.pallas_call(
        _mask_transpose_kernel,
        out_shape=jax.ShapeDtypeStruct((K, N), weight.dtype),
        grid=(N // tn_, K // tk_),
        in_specs=[
            pl.BlockSpec((tn_, tk_), lambda j, k: (j, k)),
            pl.BlockSpec((tn_, tk_), lambda j, k: (j, k)),
        ],
        out_specs=pl.BlockSpec((tk_, tn_), lambda j, k: (k, j)),
        compiler_params=pltpu.CompilerParams(
            dimension_semantics=("parallel", "parallel"),
            vmem_limit_bytes=_VMEM_LIMIT_BYTES),
    )(weight, mask)


# ---------------------------------------------------------------------------
# Kernel 2a: tiled NN matmul + bias on the pre-masked, pre-transposed weight.
#   out[i,j] += x_tile(tm,tk) @ wT_tile(tk,tn)   (+ bias at k == last)
# f32 accumulator scratch persists across the innermost "arbitrary" K axis.
# ---------------------------------------------------------------------------
def _matmul_bias_nn_kernel(x_ref, wt_ref, b_ref, o_ref, acc_ref):
    @pl.when(pl.program_id(2) == 0)
    def _():
        acc_ref[...] = jnp.zeros_like(acc_ref)

    acc_ref[...] += jnp.dot(x_ref[...], wt_ref[...],
                            preferred_element_type=jnp.float32)

    @pl.when(pl.program_id(2) == pl.num_programs(2) - 1)
    def _():
        o_ref[...] = (acc_ref[...] + b_ref[...]).astype(o_ref.dtype)


# ---------------------------------------------------------------------------
# Kernel 2b: fused variant for small M-tile counts: mask the (tn, tk) weight
# tile in-kernel (cast-mul, free under the MXU) and contract dim 1 of both
# operands (x @ W.T form) -- avoids the extra weight HBM round trip.
# ---------------------------------------------------------------------------
def _masked_matmul_bias_nt_kernel(x_ref, w_ref, m_ref, b_ref, o_ref, acc_ref):
    @pl.when(pl.program_id(2) == 0)
    def _():
        acc_ref[...] = jnp.zeros_like(acc_ref)

    w_masked = w_ref[...] * m_ref[...].astype(w_ref.dtype)
    acc_ref[...] += lax.dot_general(
        x_ref[...], w_masked,
        dimension_numbers=(((1,), (1,)), ((), ())),
        preferred_element_type=jnp.float32)

    @pl.when(pl.program_id(2) == pl.num_programs(2) - 1)
    def _():
        o_ref[...] = (acc_ref[...] + b_ref[...]).astype(o_ref.dtype)


def masked_linear(x, weight, weight_mask, bias, *, tm=512, tn=512, tk=512):
    """out = x @ (weight * weight_mask).T + bias.

    x: (M, K), weight / weight_mask: (N, K) (PyTorch nn.Linear layout),
    bias: (N,)  ->  (M, N).  Output dtype follows x.dtype.
    """
    M, K = x.shape
    N, K2 = weight.shape
    assert K == K2 and weight_mask.shape == weight.shape and bias.shape == (N,)

    # Adaptive tile sizes: lane/sublane aligned, padding waste bounded.
    tm_ = _pick_tile(M, tm, 8)
    tn_ = _pick_tile(N, tn, 128)
    tk_ = _pick_tile(K, tk, 128)
    M_pad = _round_up(M, tm_)
    N_pad = _round_up(N, tn_)
    K_pad = _round_up(K, tk_)

    # v7x megacore: guarantee >=2 blocks along a "parallel" axis so both
    # TensorCores get work (harmless on single-TC v5e/v6e).
    if (M_pad // tm_) * (N_pad // tn_) < 2:
        if tm_ >= 16:        # tm_/2 stays a multiple of 8 and divides M_pad
            tm_ //= 2
        elif tn_ >= 256:     # tn_/2 stays a multiple of 128 and divides N_pad
            tn_ //= 2

    x_p = jnp.pad(x, ((0, M_pad - M), (0, K_pad - K)))
    w_p = jnp.pad(weight, ((0, N_pad - N), (0, K_pad - K)))
    m_p = jnp.pad(weight_mask, ((0, N_pad - N), (0, K_pad - K)))
    b_p = jnp.pad(bias, (0, N_pad - N)).reshape(1, N_pad)

    grid = (M_pad // tm_, N_pad // tn_, K_pad // tk_)

    x_spec = pl.BlockSpec((tm_, tk_), lambda i, j, k: (i, k))
    b_spec = pl.BlockSpec((1, tn_), lambda i, j, k: (0, j))
    o_spec = pl.BlockSpec((tm_, tn_), lambda i, j, k: (i, j))
    scratch = [pltpu.VMEM((tm_, tn_), jnp.float32)]
    cparams = pltpu.CompilerParams(
        dimension_semantics=("parallel", "parallel", "arbitrary"),
        vmem_limit_bytes=_VMEM_LIMIT_BYTES)
    out_shape = jax.ShapeDtypeStruct((M_pad, N_pad), x.dtype)

    if grid[0] > 3:
        # Many M tiles: apply the mask (and fold the weight transpose) once in
        # the mem-bound pre-pass, then run a plain NN-contraction tiled matmul
        # (no mask mul, no RHS relayout in the MXU-bound loop).
        w_t = _apply_mask_transposed(w_p, m_p)
        wt_spec = pl.BlockSpec((tk_, tn_), lambda i, j, k: (k, j))
        out_p = pl.pallas_call(
            _matmul_bias_nn_kernel,
            out_shape=out_shape,
            grid_spec=pltpu.PrefetchScalarGridSpec(
                num_scalar_prefetch=0, grid=grid,
                in_specs=[x_spec, wt_spec, b_spec],
                out_specs=o_spec,
                scratch_shapes=scratch),
            compiler_params=cparams,
        )(x_p, w_t, b_p)
    else:
        # <=3 M tiles: fuse the mask into the matmul; re-masking each weight
        # tile <=3x is cheaper than a full extra weight-array HBM round trip.
        w_spec = pl.BlockSpec((tn_, tk_), lambda i, j, k: (j, k))
        m_spec = pl.BlockSpec((tn_, tk_), lambda i, j, k: (j, k))
        out_p = pl.pallas_call(
            _masked_matmul_bias_nt_kernel,
            out_shape=out_shape,
            grid_spec=pltpu.PrefetchScalarGridSpec(
                num_scalar_prefetch=0, grid=grid,
                in_specs=[x_spec, w_spec, m_spec, b_spec],
                out_specs=o_spec,
                scratch_shapes=scratch),
            compiler_params=cparams,
        )(x_p, w_p, m_p, b_p)

    return out_p[:M, :N]


def module_wrapper_forward(x, weight, weight_mask, bias):
    """Equivalent of ModuleWrapper(nn.Linear(K, N)).forward(x).

    x may be (..., K); leading dims are flattened to M for the kernel and
    restored afterwards (glue only — compute stays in the Pallas kernels).
    The mask is passed at its native dtype (int8/bool masks stream fewer HBM
    bytes); the cast happens in-kernel.
    """
    # TODO(synk): the PyTorch module mutates module.weight.data in place; that
    # stateful side effect has no functional-JAX equivalent and is not replicated.
    lead = x.shape[:-1]
    K = x.shape[-1]
    x2d = x.reshape(-1, K)
    out2d = masked_linear(x2d, weight, weight_mask, bias)
    return out2d.reshape(*lead, weight.shape[0])


if __name__ == "__main__":
    key = jax.random.PRNGKey(0)
    k_x, k_w, k_m, k_b = jax.random.split(key, 4)

    batch, seq, in_features, out_features = 2, 8, 32, 64

    x = jax.random.normal(k_x, (batch, seq, in_features), dtype=jnp.float32)
    weight = jax.random.normal(k_w, (out_features, in_features),
                               dtype=jnp.float32) * 0.1
    # Binary prune mask (registered `weight_mask` buffer; ones in __init__,
    # here a pruned pattern to exercise the masking path).
    weight_mask = (jax.random.uniform(k_m, (out_features, in_features))
                   > 0.5).astype(jnp.float32)
    bias = jax.random.normal(k_b, (out_features,), dtype=jnp.float32) * 0.01

    ref_w = weight * weight_mask

    # Small path: few M tiles -> fused mask-in-matmul kernel (grid[0] split to 2
    # for v7x megacore).
    out = module_wrapper_forward(x, weight, weight_mask, bias)
    out = jax.block_until_ready(out)
    ref = jnp.einsum("bsk,nk->bsn", x, ref_w) + bias
    assert out.shape == (batch, seq, out_features)
    assert jnp.allclose(out, ref, atol=1e-4, rtol=1e-4)

    # Medium-M path: still fused (2 M tiles after the megacore split).
    x_med = jax.random.normal(k_x, (4, 128, in_features), dtype=jnp.float32)
    out_med = module_wrapper_forward(x_med, weight, weight_mask, bias)
    out_med = jax.block_until_ready(out_med)
    ref_med = jnp.einsum("bsk,nk->bsn", x_med, ref_w) + bias
    assert out_med.shape == (4, 128, out_features)
    assert jnp.allclose(out_med, ref_med, atol=1e-4, rtol=1e-4)

    # Large-M path: >3 M tiles -> hoisted pre-mask+transpose pass followed by
    # the plain NN-contraction tiled matmul.
    x_big = jax.random.normal(k_x, (16, 160, in_features), dtype=jnp.float32)
    out_big = module_wrapper_forward(x_big, weight, weight_mask, bias)
    out_big = jax.block_until_ready(out_big)
    ref_big = jnp.einsum("bsk,nk->bsn", x_big, ref_w) + bias
    assert out_big.shape == (16, 160, out_features)
    assert jnp.allclose(out_big, ref_big, atol=1e-4, rtol=1e-4)

    print("KERNEL_OK")
</pallas_src>

<mosaic_0001>
module attributes {stable_mosaic.version = 11 : i64} {
  func.func @_masked_matmul_bias_nt_kernel(%arg0: i32, %arg1: i32, %arg2: i32, %arg3: memref<8x128xf32, #tpu.memory_space<vmem>>, %arg4: memref<128x128xf32, #tpu.memory_space<vmem>>, %arg5: memref<128x128xf32, #tpu.memory_space<vmem>>, %arg6: memref<1x128xf32, #tpu.memory_space<vmem>>, %arg7: memref<8x128xf32, #tpu.memory_space<vmem>>, %arg8: memref<8x128xf32, #tpu.memory_space<vmem>>) attributes {dimension_semantics = [#tpu.dimension_semantics<parallel>, #tpu.dimension_semantics<parallel>, #tpu.dimension_semantics<arbitrary>], iteration_bounds = array<i64: 2, 1, 1>, scalar_prefetch = 0 : i64, scratch_operands = 1 : i64, tpu.core_type = #tpu.core_type<tc>, window_params = [{transform_indices = @transform_0, window_bounds = array<i64: 8, 128>}, {transform_indices = @transform_1, window_bounds = array<i64: 128, 128>}, {transform_indices = @transform_2, window_bounds = array<i64: 128, 128>}, {transform_indices = @transform_3, window_bounds = array<i64: 1, 128>}, {transform_indices = @transform_4, window_bounds = array<i64: 8, 128>}]} {
    %c0_i32 = arith.constant 0 : i32
    %0 = arith.cmpi eq, %arg2, %c0_i32 : i32
    %1 = arith.extui %0 : i1 to i32
    %c0_i32_0 = arith.constant 0 : i32
    %2 = arith.cmpi ne, %1, %c0_i32_0 : i32
    scf.if %2 {
      %cst_12 = arith.constant 0.000000e+00 : f32
      %14 = vector.broadcast %cst_12 : f32 to vector<8x128xf32>
      %c0_13 = arith.constant 0 : index
      %c0_14 = arith.constant 0 : index
      %15 = vector.load %arg8[%c0_13, %c0_14] : memref<8x128xf32, #tpu.memory_space<vmem>>, vector<8x128xf32>
      tpu.vector_store %arg8[%c0_13, %c0_14], %14 {strides = array<i32>} : memref<8x128xf32, #tpu.memory_space<vmem>>, vector<8x128xf32>,
    } else {
    }
    %c0 = arith.constant 0 : index
    %c0_1 = arith.constant 0 : index
    %3 = vector.load %arg4[%c0, %c0_1] : memref<128x128xf32, #tpu.memory_space<vmem>>, vector<128x128xf32>
    %c0_2 = arith.constant 0 : index
    %c0_3 = arith.constant 0 : index
    %4 = vector.load %arg5[%c0_2, %c0_3] : memref<128x128xf32, #tpu.memory_space<vmem>>, vector<128x128xf32>
    %5 = arith.mulf %3, %4 : vector<128x128xf32>
    %c0_4 = arith.constant 0 : index
    %c0_5 = arith.constant 0 : index
    %6 = vector.load %arg8[%c0_4, %c0_5] : memref<8x128xf32, #tpu.memory_space<vmem>>, vector<8x128xf32>
    %c0_6 = arith.constant 0 : index
    %c0_7 = arith.constant 0 : index
    %7 = vector.load %arg3[%c0_6, %c0_7] : memref<8x128xf32, #tpu.memory_space<vmem>>, vector<8x128xf32>
    %cst = arith.constant dense<0.000000e+00> : vector<8x128xf32>
    %8 = tpu.matmul %7, %5, %cst {dimension_numbers = #tpu.dot_dimension_numbers<[1], [1], [0], [0], [0, 0, 1, 0], [], []>} : vector<8x128xf32>, vector<128x128xf32>, vector<8x128xf32> -> vector<8x128xf32>
    %9 = arith.addf %6, %8 : vector<8x128xf32>
    %c0_8 = arith.constant 0 : index
    %c0_9 = arith.constant 0 : index
    %10 = vector.load %arg8[%c0_8, %c0_9] : memref<8x128xf32, #tpu.memory_space<vmem>>, vector<8x128xf32>
    tpu.vector_store %arg8[%c0_8, %c0_9], %9 {strides = array<i32>} : memref<8x128xf32, #tpu.memory_space<vmem>>, vector<8x128xf32>,
    %c0_i32_10 = arith.constant 0 : i32
    %11 = arith.cmpi eq, %arg2, %c0_i32_10 : i32
    %12 = arith.extui %11 : i1 to i32
    %c0_i32_11 = arith.constant 0 : i32
    %13 = arith.cmpi ne, %12, %c0_i32_11 : i32
    scf.if %13 {
      %c0_12 = arith.constant 0 : index
      %c0_13 = arith.constant 0 : index
      %14 = vector.load %arg8[%c0_12, %c0_13] : memref<8x128xf32, #tpu.memory_space<vmem>>, vector<8x128xf32>
      %c0_14 = arith.constant 0 : index
      %c0_15 = arith.constant 0 : index
      %15 = vector.load %arg6[%c0_14, %c0_15] : memref<1x128xf32, #tpu.memory_space<vmem>>, vector<1x128xf32>
      %16 = vector.broadcast %15 : vector<1x128xf32> to vector<8x128xf32>
      %17 = arith.addf %14, %16 : vector<8x128xf32>
      %c0_16 = arith.constant 0 : index
      %c0_17 = arith.constant 0 : index
      %18 = vector.load %arg7[%c0_16, %c0_17] : memref<8x128xf32, #tpu.memory_space<vmem>>, vector<8x128xf32>
      tpu.vector_store %arg7[%c0_16, %c0_17], %17 {strides = array<i32>} : memref<8x128xf32, #tpu.memory_space<vmem>>, vector<8x128xf32>,
    } else {
    }
    return
  }
  func.func @transform_0(%arg0: i32, %arg1: i32, %arg2: i32) -> (i32, i32) {
    %c0_i32 = arith.constant 0 : i32
    return %arg0, %arg2 : i32, i32
  }
  func.func @transform_1(%arg0: i32, %arg1: i32, %arg2: i32) -> (i32, i32) {
    %c0_i32 = arith.constant 0 : i32
    return %arg1, %arg2 : i32, i32
  }
  func.func @transform_2(%arg0: i32, %arg1: i32, %arg2: i32) -> (i32, i32) {
    %c0_i32 = arith.constant 0 : i32
    return %arg1, %arg2 : i32, i32
  }
  func.func @transform_3(%arg0: i32, %arg1: i32, %arg2: i32) -> (i32, i32) {
    %c0_i32 = arith.constant 0 : i32
    %c0_i32_0 = arith.constant 0 : i32
    return %c0_i32, %arg1 : i32, i32
  }
  func.func @transform_4(%arg0: i32, %arg1: i32, %arg2: i32) -> (i32, i32) {
    %c0_i32 = arith.constant 0 : i32
    return %arg0, %arg1 : i32, i32
  }
}

</mosaic_0001>

<bundles_post_ra>
// kernel: tpu_custom_call.1
= control target key start
LH: loop header
LB: loop body
LE: loop exit
PB: predicated region body
PF: predicated region fallthrough
CT: control target
= control target key end

     0   :  { %9 = vsyncpa [#allocation4], 0  ;;  %s1145_s0 = inlined_call_operand.hbm [shape: f32[16,128], index: 0, kind: input, shape index: {}]   ;;  %s1146_s1 = inlined_call_operand.hbm [shape: f32[128,128], index: 1, kind: input, shape index: {}]   ;;  %s1147_s2 = inlined_call_operand.hbm [shape: f32[128,128], index: 2, kind: input, shape index: {}]   ;;  %s1148_s3 = inlined_call_operand.vmem [shape: f32[1,128], index: 3, kind: input, shape index: {}]   ;;  %s1149_s4 = inlined_call_operand.hbm [shape: f32[16,128], index: 4, kind: output, shape index: {}]  }
   0x1   :  { %11 = vsyncpa [#allocation4 + $0x1], 0 }
   0x2   :  { %12 = vsyncpa [#allocation7], 0 }
   0x3   :  { %13 = vsyncpa [#allocation5], 0 }
   0x4   :  { %15 = vsyncpa [#allocation5 + $0x1], 0  ;;  %s938_s15 = smov 0   ;;  %s940_s16 = smov 0  }
   0x5   :  { %s942_s17 = smov 0   ;;  %s944_s18 = smov 0  }
   0x6   :  { %s946_s19 = smov 0   ;;  %s948_s20 = smov 0  }
   0x7 LB: > { %s581_s21 = sadd.s32 4294967295, %s903_s20   ;;  %s582_s22 = sadd.s32 4294967294, %s903_s20   ;;  %s903_s20 = sphi %s948_s20, %s21_s20   ;;  %s899_s19 = sphi %s946_s19, %s1169_s19   ;;  %s895_s18 = sphi %s944_s18, %s1168_s18   ;;  %s891_s17 = sphi %s942_s17, %s1167_s17   ;;  %s887_s16 = sphi %s940_s16, %s1166_s16   ;;  %s883_s15 = sphi %s938_s15, %s1165_s15  }
   0x8   : > { %p62_p0 = scmp.ne.s32.totalorder %s887_s16, %s883_s15  ;;  %p972_p1 = scmp.eq.s32.totalorder %s581_s21, 0 }
   0x9   : > { %p976_p2 = scmp.eq.s32.totalorder %s581_s21, 1  ;;  %p176_p3 = scmp.eq.s32.totalorder %s582_s22, 1 }
   0xa   : > { %s1153_s23 = scalar_select %p972_p1, 1, 0 }
   0xb   : > { %p982_p4 = por %p972_p1, %p62_p0  ;;  %p583_p5 = scmp.ge.s32.totalorder %s903_s20, 1 }
   0xc   : > { %p987_p6 = por %p176_p3, %p62_p0  ;;  %p183_p7 = scmp.lt.s32.totalorder %s903_s20, 3 }
   0xd   : > { %s1155_s25 = scalar_select %p982_p4, 1, 0 }
   0xe   : > { %s1156_s26 = scalar_select %p987_p6, 1, 0 }
   0xf   : > { %p992_p8 = pnand %p583_p5, %p183_p7  ;;  %s905_s28 = smov [#allocation6]  }
  0x10   : > { %s199_s29 = sshll.u32 %s905_s28, 4  ;;  %s906_s5 = smov [#allocation8]   ;;  %s200_s29 = int_to_ptr.vmem [resolvable:$true] %s199_s29 }
  0x11   : > { %p664_p9 = pneg %p992_p8  ;;  %s216_s6 = sshll.u32 %s906_s5, 4  ;;  %s217_s6 = int_to_ptr.vmem [resolvable:$true] %s216_s6 }
  0x12   : > { %s750_s7 = scalar_lea.vmem %s200_s29, 2048  ;;  %p758_p5 = scmp.lt.s32.totalorder %s200_s29, %s200_s29 }
  0x13   : > { %p1001_p11 = pnand %p664_p9, %p972_p1  ;;  %p751_p13 = scmp.ne.s32.totalorder %s200_s29, %s750_s7 }
  0x14   : > { %p759_p7 = scmp.lt.s32.totalorder %s750_s7, %s750_s7 }
  0x15   : > { %p741_p12 = pneg %p1001_p11 }
  0x16   : > { %p760_p10 = por %p759_p7, %p758_p5 }
  0x17   : > { %p753_p0 = pnand %p751_p13, %p741_p12 }
  0x19   : > { %p754_p3 = pneg %p753_p0 }
  0x1b   : > { %p761_p9 = pnand %p760_p10, %p754_p3 }
  0x1d   : > { %764 = shalt.err (!%p761_p9)
}
  0x1e   : > { %s907_s8 = smov 128   ;;  %s908_s9 = smov 8  }
  0x1f   : > { %667 = dma.hbm_to_vmem [thread:$0]  (!%p1001_p11), %s1146_s1, 2048, %s200_s29, [#allocation7], %s907_s8, %s907_s8, %s908_s9  }
  0x20   : > { %s776_s12 = scalar_lea.vmem %s217_s6, 2048  ;;  %p784_p1 = scmp.lt.s32.totalorder %s217_s6, %s217_s6 }
  0x21   : > { %p777_p6 = scmp.ne.s32.totalorder %s217_s6, %s776_s12  ;;  %p785_p4 = scmp.lt.s32.totalorder %s776_s12, %s776_s12 }
  0x23   : > { %p779_p13 = pnand %p777_p6, %p741_p12  ;;  %p786_p5 = por %p785_p4, %p784_p1 }
  0x25   : > { %p780_p0 = pneg %p779_p13 }
  0x27   : > { %p787_p10 = pnand %p786_p5, %p780_p0 }
  0x29   : > { %790 = shalt.err (!%p787_p10)
}
  0x2a   : > { %670 = dma.hbm_to_vmem [thread:$0]  (!%p1001_p11), %s1147_s2, 2048, %s217_s6, [#allocation7], %s907_s8, %s907_s8, %s908_s9  }
  0x2b   : > { %s40_s21 = sadd.s32 1, %s899_s19  ;;  %s49_s22 = sadd.s32 1, %s891_s17 }
  0x2c   : > { %p42_p1 = scmp.ge.s32.totalorder %s40_s21, 2  ;;  %p56_p4 = scmp.ne.s32.totalorder %s891_s17, %s887_s16 }
  0x2d   : > { %p57_p6 = scmp.eq.s32.totalorder %s903_s20, 0  ;;  %p681_p12 = scmp.lt.s32.totalorder %s903_s20, 2 }
  0x2e   : > { %s1171_s21 = smov (%p42_p1, %s40_s21), 0  ;;  %p1033_p7 = por %p976_p2, %p56_p4 }
  0x2f   : > { %p58_p3 = por %p57_p6, %p56_p4  ;;  %s44_s29 = ssub.s32 %s899_s19, %s1171_s21 }
  0x30   : > { %s236_s30 = sand.u32 1, %s891_s17   ;;  %p47_p9 = scmp.eq.s32.totalorder %s44_s29, 0 }
  0x31   : > { %s588_s5 = sshll.u32 %s236_s30, 3  ;;  %s589_s6 = sshll.u32 %s899_s19, 7 }
  0x32   : > { %s1042_s7 = scalar_select %p47_p9, %s891_s17, %s49_s22  }
  0x33   : > { %s246_s10 = scalar_lea.hbm %s1145_s0, %s589_s6  ;;  %s240_s11 = scalar_lea.vmem [#allocation3], %s588_s5 }
  0x34   : > { %s248_s12 = sshll.u32 %s240_s11, 4  ;;  %p1049_p11 = pnand %p681_p12, %p58_p3  ;;  %s249_s12 = int_to_ptr.vmem [resolvable:$true] %s248_s12 }
  0x35   : > { %s237_s13 = scalar_lea.sflag [#allocation4], %s236_s30  ;;  %s804_s14 = scalar_lea.vmem %s249_s12, 128 }
  0x36   : > { %p793_p2 = pneg %p1049_p11  ;;  %p805_p13 = scmp.ne.s32.totalorder %s249_s12, %s804_s14 }
  0x37   : > { %s909_s22 = smov [#allocation3]  }
  0x38   : > { %p807_p0 = pnand %p805_p13, %p793_p2  ;;  %s809_s29 = sshll.u32 %s909_s22, 4  ;;  %s810_s29 = int_to_ptr.vmem [resolvable:$false] %s809_s29 }
  0x39   : > { %s811_s6 = scalar_lea.vmem %s810_s29, 256  ;;  %p812_p10 = scmp.lt.s32.totalorder %s249_s12, %s810_s29 }
  0x3a   : > { %p808_p5 = pneg %p807_p0  ;;  %p813_p1 = scmp.lt.s32.totalorder %s811_s6, %s804_s14 }
  0x3c   : > { %p814_p4 = por %p813_p1, %p812_p10 }
  0x3e   : > { %p815_p6 = pnand %p814_p4, %p808_p5 }
  0x40   : > { %818 = shalt.err (!%p815_p6)
}
  0x41   : > { %674 = dma.hbm_to_vmem [thread:$0]  (!%p1049_p11), %s246_s10, 128, %s249_s12, %s237_s13  }
  0x42   : > { %257 = sbr.rel (%p992_p8) target bundleno = 350 (0x15e), region = 36  ;;  %s1060_s30 = sand.u32 (!%p992_p8), 1, %s887_s16  }
  0x43   : > { %s591_s5 = sshll.u32 (!%p992_p8), %s1060_s30, 3  ;;  %s260_s8 = scalar_lea.sflag (!%p992_p8), [#allocation4], %s1060_s30 }
  0x44   : > { %s1066_s9 = scalar_lea.vmem (!%p992_p8), [#allocation3], %s591_s5  ;;  %p1161_p12 = scmp.ne.s32.totalorder (!%p992_p8), %s1155_s25, 0 }
  0x47   : > { %870 = dma.done.wait (%p1161_p12), %s260_s8, 128  }
  0x48   : > { %872 = vsyncadd (%p1161_p12), %s260_s8, 4294967168  ;;  %p1162_p3 = scmp.ne.s32.totalorder %s1153_s23, 0 }
  0x4a   : > { %874 = dma.done.wait (%p1162_p3), [#allocation7], 4096  }
  0x4b   : > { %876 = vsyncadd (%p1162_p3), [#allocation7], 4294963200  ;;  %v910_v0 = vmov 0.0   ;;  %vm911_vm0 = vmmov 0   ;;  %v324_v1 = vld [vmem:[#allocation6 + $0x78] sm:$0xff]  ;;  %v323_v3 = vld [vmem:[#allocation6 + $0x70] sm:$0xff] }
  0x4c   : > { %617 = vmatprep.subr.mxu0 %v910_v0  ;;  %649 = vmatprep.mubr.msk.f32.mxu0 %vm911_vm0, %v910_v0  ;;  %v340_v2 = vld [vmem:[#allocation8 + $0x78] sm:$0xff]  ;;  %v339_v5 = vld [vmem:[#allocation8 + $0x70] sm:$0xff]  ;;  %v322_v7 = vld [vmem:[#allocation6 + $0x68] sm:$0xff]  ;;  %s597_s27 = sshll.u32 %s895_s18, 7  ;;  %s298_s10 = scalar_lea.vmem [#allocation9], %s591_s5 }
  0x4d   : > { %v356_v4 = vmul.f32 %v340_v2, %v324_v1  ;;  %v355_v6 = vmul.f32 %v339_v5, %v323_v3  ;;  %v338_v8 = vld [vmem:[#allocation8 + $0x68] sm:$0xff]  ;;  %v321_v10 = vld [vmem:[#allocation6 + $0x60] sm:$0xff]  ;;  %v320_v13 = vld [vmem:[#allocation6 + $0x58] sm:$0xff]  ;;  %s459_s11 = sshll.u32 %s298_s10, 4  ;;  %s1103_s13 = scalar_lea.hbm %s1149_s4, %s597_s27  ;;  %s460_s11 = int_to_ptr.vmem [resolvable:$true] %s459_s11 }
  0x4e   : > { %v354_v9 = vmul.f32 %v338_v8, %v322_v7  ;;  %v337_v11 = vld [vmem:[#allocation8 + $0x60] sm:$0xff]  ;;  %v336_v14 = vld [vmem:[#allocation8 + $0x58] sm:$0xff]  ;;  %v319_v16 = vld [vmem:[#allocation6 + $0x50] sm:$0xff]  ;;  %s445_s14 = scalar_lea.sflag [#allocation5], %s1060_s30  ;;  %s819_s22 = scalar_lea.vmem %s460_s11, 128 }
  0x4f   : > { %618 = vmatpush3.xpose.msra.mxu0 %v356_v4  ;;  %v353_v12 = vmul.f32 %v337_v11, %v321_v10  ;;  %v352_v15 = vmul.f32 %v336_v14, %v320_v13  ;;  %v335_v17 = vld [vmem:[#allocation8 + $0x50] sm:$0xff]  ;;  %v318_v19 = vld [vmem:[#allocation6 + $0x48] sm:$0xff]  ;;  %v317_v22 = vld [vmem:[#allocation6 + $0x40] sm:$0xff]  ;;  %p820_p8 = scmp.ne.s32.totalorder %s460_s11, %s819_s22  ;;  %s912_s18 = smov [#allocation9]  }
  0x50   : > { %619 = vmatprep.subr.mxu0 %v910_v0  ;;  %v351_v18 = vmul.f32 %v335_v17, %v319_v16  ;;  %v334_v20 = vld [vmem:[#allocation8 + $0x48] sm:$0xff]  ;;  %v333_v23 = vld [vmem:[#allocation8 + $0x40] sm:$0xff]  ;;  %v316_v25 = vld [vmem:[#allocation6 + $0x38] sm:$0xff]  ;;  %s823_s29 = sshll.u32 %s912_s18, 4  ;;  %s824_s29 = int_to_ptr.vmem [resolvable:$false] %s823_s29 }
  0x51   : > { %v350_v21 = vmul.f32 %v334_v20, %v318_v19  ;;  %v349_v24 = vmul.f32 %v333_v23, %v317_v22  ;;  %v332_v26 = vld [vmem:[#allocation8 + $0x38] sm:$0xff]  ;;  %v315_v28 = vld [vmem:[#allocation6 + $0x30] sm:$0xff]  ;;  %v314_v31 = vld [vmem:[#allocation6 + $0x28] sm:$0xff]  ;;  %p821_p9 = pnand %p820_p8, %p1033_p7  ;;  %s825_s6 = scalar_lea.vmem %s824_s29, 256 }
  0x52   : > { %v348_v27 = vmul.f32 %v332_v26, %v316_v25  ;;  %v331_v29 = vld [vmem:[#allocation8 + $0x30] sm:$0xff]  ;;  %v330_v32 = vld [vmem:[#allocation8 + $0x28] sm:$0xff]  ;;  %v313_v34 = vld [vmem:[#allocation6 + $0x20] sm:$0xff]  ;;  %p826_p2 = scmp.lt.s32.totalorder %s460_s11, %s824_s29  ;;  %p827_p13 = scmp.lt.s32.totalorder %s825_s6, %s819_s22 }
  0x53   : > { %620 = vmatpush3.xpose.msra.mxu0 %v355_v6  ;;  %v347_v30 = vmul.f32 %v331_v29, %v315_v28  ;;  %v346_v33 = vmul.f32 %v330_v32, %v314_v31  ;;  %v329_v35 = vld [vmem:[#allocation8 + $0x20] sm:$0xff]  ;;  %v312_v37 = vld [vmem:[#allocation6 + $0x18] sm:$0xff]  ;;  %v311_v40 = vld [vmem:[#allocation6 + $0x10] sm:$0xff]  ;;  %p822_p11 = pneg %p821_p9 }
  0x54   : > { %621 = vmatprep.subr.mxu0 %v910_v0  ;;  %v345_v36 = vmul.f32 %v329_v35, %v313_v34  ;;  %v328_v38 = vld [vmem:[#allocation8 + $0x18] sm:$0xff]  ;;  %v327_v41 = vld [vmem:[#allocation8 + $0x10] sm:$0xff]  ;;  %v310_v43 = vld [vmem:[#allocation6 + $0x8] sm:$0xff]  ;;  %p828_p0 = por %p827_p13, %p826_p2 }
  0x55   : > { %v344_v39 = vmul.f32 %v328_v38, %v312_v37  ;;  %v343_v42 = vmul.f32 %v327_v41, %v311_v40  ;;  %v326_v44 = vld [vmem:[#allocation8 + $0x8] sm:$0xff]  ;;  %v309_v46 = vld [vmem:[#allocation6] sm:$0xff]  ;;  %v358_v49 = vld [vmem:[%s1066_s9] sm:$0xff] }
  0x56   : > { %v342_v45 = vmul.f32 %v326_v44, %v310_v43  ;;  %v325_v47 = vld [vmem:[#allocation8] sm:$0xff]  ;;  %v595_v50 = vld [vmem:[%s1148_s3] ss:$0 sm:$0xff]  ;;  %p829_p5 = pnand %p828_p0, %p822_p11 }
  0x57   : > { %622 = vmatpush3.xpose.msra.mxu0 %v354_v9  ;;  %v341_v48 = vmul.f32 %v325_v47, %v309_v46 }
  0x58   : > { %623 = vmatprep.subr.mxu0 %v910_v0 }
  0x5b   : > { %624 = vmatpush3.xpose.msra.mxu0 %v353_v12 }
  0x5c   : > { %625 = vmatprep.subr.mxu0 %v910_v0 }
  0x5f   : > { %626 = vmatpush3.xpose.msra.mxu0 %v352_v15 }
  0x60   : > { %627 = vmatprep.subr.mxu0 %v910_v0 }
  0x63   : > { %628 = vmatpush3.xpose.msra.mxu0 %v351_v18 }
  0x64   : > { %629 = vmatprep.subr.mxu0 %v910_v0 }
  0x67   : > { %630 = vmatpush3.xpose.msra.mxu0 %v350_v21 }
  0x68   : > { %631 = vmatprep.subr.mxu0 %v910_v0 }
  0x6b   : > { %632 = vmatpush3.xpose.msra.mxu0 %v349_v24 }
  0x6c   : > { %633 = vmatprep.subr.mxu0 %v910_v0 }
  0x6f   : > { %634 = vmatpush3.xpose.msra.mxu0 %v348_v27 }
  0x70   : > { %635 = vmatprep.subr.mxu0 %v910_v0 }
  0x73   : > { %636 = vmatpush3.xpose.msra.mxu0 %v347_v30 }
  0x74   : > { %637 = vmatprep.subr.mxu0 %v910_v0 }
  0x77   : > { %638 = vmatpush3.xpose.msra.mxu0 %v346_v33 }
  0x78   : > { %639 = vmatprep.subr.mxu0 %v910_v0 }
  0x7b   : > { %640 = vmatpush3.xpose.msra.mxu0 %v345_v36 }
  0x7c   : > { %641 = vmatprep.subr.mxu0 %v910_v0 }
  0x7f   : > { %642 = vmatpush3.xpose.msra.mxu0 %v344_v39 }
  0x80   : > { %643 = vmatprep.subr.mxu0 %v910_v0 }
  0x83   : > { %644 = vmatpush3.xpose.msra.mxu0 %v343_v42 }
  0x84   : > { %645 = vmatprep.subr.mxu0 %v910_v0 }
  0x87   : > { %646 = vmatpush3.xpose.msra.mxu0 %v342_v45 }
  0x88   : > { %647 = vmatprep.subr.mxu0 %v910_v0 }
  0x8b   : > { %648 = vmatpush3.xpose.msra.mxu0 %v341_v48 }
  0x8e   : > { %650 = vmatmul.mubr.f32.vlgmr.msra.gmra.mxu0 %v358_v49 }
 0x14e   : > { %v425_v51 = vpop.f32.mrf.mxu0 }
 0x14f   : > { %v442_v52 = vadd.f32 %v595_v50, %v425_v51 }
 0x150   : > { %v651_v53 = vpop.f32.mrf.mxu0 }
 0x151   : > { %443 = vst [vmem:[%s298_s10] sm:$0xff] %v442_v52 }
 0x152   : > { %832 = shalt.err (!%p829_p5)
}
 0x153   : > { %s833_s5 = scalar_lea.hbm %s1103_s13, 128  ;;  %s837_s9 = scalar_lea.hbm %s1149_s4, 256 }
 0x154   : > { %p834_p10 = scmp.ne.s32.totalorder %s1103_s13, %s833_s5  ;;  %p838_p6 = scmp.lt.s32.totalorder %s1103_s13, %s1149_s4 }
 0x155   : > { %p839_p12 = scmp.lt.s32.totalorder %s837_s9, %s833_s5 }
 0x156   : > { %p835_p1 = pnand %p834_p10, %p1033_p7 }
 0x157   : > { %p840_p3 = por %p839_p12, %p838_p6 }
 0x158   : > { %p836_p4 = pneg %p835_p1 }
 0x15a   : > { %p841_p8 = pnand %p840_p3, %p836_p4 }
 0x15c   : > { %844 = shalt.err (!%p841_p8)
}
 0x15d   : > { %662 = dma.vmem_to_hbm [thread:$0]  (%p1033_p7), %s460_s11, 128, %s1103_s13, %s445_s14  }
 0x15e PF: > { %s471_s27 = sand.u32 1, %s883_s15   ;;  %p1163_p9 = scmp.ne.s32.totalorder %s1156_s26, 0 }
 0x15f   : > { %p1164_p11 = scmp.ge.s32.totalorder %s903_s20, 2  ;;  %s472_s10 = scalar_lea.sflag [#allocation5], %s471_s27 }
 0x161   : > { %p676_p2 = pnand %p1164_p11, %p1163_p9 }
 0x163   : > { %p677_p13 = pneg %p676_p2 }
 0x165   : > { %878 = dma.done.wait (%p677_p13), %s472_s10, 128  }
 0x166   : > { %880 = vsyncadd (%p677_p13), %s472_s10, 4294967168  ;;  %s21_s20 = sadd.s32 1, %s903_s20   ;;  %s1165_s15 = smov %s887_s16 }
 0x167   : > { %p18_p0 = scmp.ge.s32.totalorder %s21_s20, 4   ;;  %s1166_s16 = smov %s891_s17 }
 0x168   : > { %s1167_s17 = smov %s1042_s7  ;;  %s1168_s18 = smov %s899_s19 }
 0x169   : > { %s1169_s19 = smov %s1171_s21  ;;  %20 = sbr.rel (!%p18_p0) target bundleno = 7 (0x7), region = 102 }
 0x16e   :  { %477 = vsyncpa [#allocation4], 1 }
 0x16f   :  { %479 = vsyncpa [#allocation4 + $0x1], 1 }
 0x170   :  { %480 = vsyncpa [#allocation7], 1 }
 0x171   :  { %481 = vsyncpa [#allocation5], 1 }
 0x172   :  { %483 = vsyncpa [#allocation5 + $0x1], 1 }

</bundles_post_ra>
